<compile_context>
chip_gen: v6e
topology: v6e:2x2x1
jax: 0.10.0
libtpu: 0.0.40
codegen_flags: <defaults>
</compile_context>

<pallas_src>
import jax
import jax.numpy as jnp
from jax import lax
from jax.experimental import pallas as pl
from jax.experimental.pallas import tpu as pltpu

EPS = 1e-08  # only used by the normalize / cosine path of the original module.


def _round_up(x, m):
    return ((x + m - 1) // m) * m


def _row_align(dtype):
    """Sublane-pack multiple of the row axis: 8 (f32), 16 (bf16), 32 (int8/fp8)."""
    return 8 * max(1, 4 // jnp.dtype(dtype).itemsize)


def _vmem_budget_bytes():
    """Per-chip VMEM budget with headroom (v7x: 64 MiB phys; v5e/v6e: 128 MiB)."""
    try:
        cap = int(pltpu.get_tpu_info().vmem_capacity_bytes)
    except Exception:
        cap = 64 << 20  # conservative default = v7x per-TensorCore VMEM
    return int(min(cap * 3 // 4, 96 << 20))


# -----------------------------------------------------------------------------
# fit kernel: prototypes (mean per class), 2*prototypes (matmul operand), ||p||^2
# -----------------------------------------------------------------------------
def _fit_kernel(onehot_ref, support_ref, protos_ref, proto_op_ref, psq_ref):
    # One-shot kernel: accuracy over throughput, accumulate in f32.
    sup = support_ref[...].astype(jnp.float32)                       # (S, D_pad)
    # 1/counts is pre-folded into the one-hot rows -> pure matmul, no divide.
    protos = lax.dot_general(
        onehot_ref[...], sup,
        dimension_numbers=(((1,), (0,)), ((), ())),
        preferred_element_type=jnp.float32)                          # (C_pad, D_pad)
    protos_ref[...] = protos
    # Cross-matmul operand for the forward kernel: 2*protos in compute dtype.
    proto_op_ref[...] = (2.0 * protos).astype(proto_op_ref.dtype)
    # ||p_c||^2 as a (1, C_pad) row via a ones-row NT matmul (no relayout).
    pp = protos * protos
    psq_ref[...] = lax.dot_general(
        jnp.ones((1, pp.shape[1]), jnp.float32), pp,
        dimension_numbers=(((1,), (1,)), ((), ())),
        preferred_element_type=jnp.float32)                          # (1, C_pad)


def protonet_fit(onehot_scaled, support_padded, compute_dtype):
    c_pad, s = onehot_scaled.shape
    s2, d_pad = support_padded.shape
    assert s2 == s
    comp_bytes = jnp.dtype(compute_dtype).itemsize
    budget = _vmem_budget_bytes()
    est = 2 * (4 * c_pad * s + 4 * s * d_pad + 4 * c_pad * d_pad
               + comp_bytes * c_pad * d_pad + 4 * 8 * c_pad) + (2 << 20)
    vmem_limit = int(min(max(est, 4 << 20), budget))
    return pl.pallas_call(
        _fit_kernel,
        out_shape=(
            jax.ShapeDtypeStruct((c_pad, d_pad), jnp.float32),
            jax.ShapeDtypeStruct((c_pad, d_pad), compute_dtype),
            jax.ShapeDtypeStruct((1, c_pad), jnp.float32),
        ),
        grid=(1,),
        in_specs=[
            pl.BlockSpec((c_pad, s), lambda i: (0, 0)),
            pl.BlockSpec((s, d_pad), lambda i: (0, 0)),
        ],
        out_specs=(
            pl.BlockSpec((c_pad, d_pad), lambda i: (0, 0)),
            pl.BlockSpec((c_pad, d_pad), lambda i: (0, 0)),
            pl.BlockSpec((1, c_pad), lambda i: (0, 0)),
        ),
        compiler_params=pltpu.CompilerParams(
            dimension_semantics=("arbitrary",),
            vmem_limit_bytes=vmem_limit,
        ),
    )(onehot_scaled, support_padded)


# -----------------------------------------------------------------------------
# forward kernel: logits[m, c] = -(||q_m||^2 + ||p_c||^2 - 2 q_m.p_c)
# -----------------------------------------------------------------------------
def _forward_kernel(proto_op_ref, psq_ref, q_ref, logits_ref):
    q = q_ref[...]                                                   # (TM, D_pad) native dtype
    qf = q.astype(jnp.float32)
    q_sq = jnp.sum(qf * qf, axis=-1, keepdims=True)                  # (TM, 1) f32 accumulation
    # NT dot_general on native-dtype operands (bf16 MXU path when inputs are
    # bf16); proto_op already holds 2*prototypes -> no '*2' VPU pass needed.
    cross2 = lax.dot_general(
        q, proto_op_ref[...],
        dimension_numbers=(((1,), (1,)), ((), ())),
        preferred_element_type=jnp.float32)                          # (TM, C_pad) = 2 q.p
    # -(q^2 + p^2 - 2qp) <= 0 always; minimum fuses negate + cancellation guard.
    logits_ref[...] = jnp.minimum(cross2 - q_sq - psq_ref[...], 0.0)


def protonet_forward(proto_op, psq, queries_padded, *, tm_max=2048):
    """Streams query tiles against resident (2*prototypes, ||p||^2) in VMEM."""
    c_pad, d_pad = proto_op.shape
    m_pad, d2 = queries_padded.shape
    assert d2 == d_pad
    comp_bytes = jnp.dtype(queries_padded.dtype).itemsize
    align = _row_align(queries_padded.dtype)
    assert m_pad % align == 0

    budget = _vmem_budget_bytes()
    # Conservative bookkeeping: assume resident blocks stay double-buffered even
    # if the Buffered(1) request below is honored.
    resident = 2 * (c_pad * d_pad * comp_bytes) + 2 * (8 * c_pad * 4)
    per_row = 2 * (d_pad * comp_bytes) + 2 * (c_pad * 4)   # q tile + logits tile, x2 buffers
    # TODO(synk): if `resident` alone exceeds the VMEM budget (huge C*D), the
    # class axis would additionally need tiling; not implemented here.
    avail = budget - resident - (1 << 20)
    tm = avail // per_row if per_row > 0 else tm_max
    tm = max(align, (tm // align) * align)
    tm = int(min(tm, tm_max, m_pad))
    grid = (pl.cdiv(m_pad, tm),)
    vmem_limit = int(min(max(resident + per_row * tm + (2 << 20), 4 << 20), budget))

    def run(single_buffer_resident):
        res_kw = {"pipeline_mode": pl.Buffered(1)} if single_buffer_resident else {}
        return pl.pallas_call(
            _forward_kernel,
            out_shape=jax.ShapeDtypeStruct((m_pad, c_pad), jnp.float32),
            grid=grid,
            in_specs=[
                pl.BlockSpec((c_pad, d_pad), lambda i: (0, 0), **res_kw),  # resident 2*protos
                pl.BlockSpec((1, c_pad), lambda i: (0, 0), **res_kw),      # resident ||p||^2
                pl.BlockSpec((tm, d_pad), lambda i: (i, 0)),               # streamed queries
            ],
            out_specs=pl.BlockSpec((tm, c_pad), lambda i: (i, 0)),         # lane-dense logits
            compiler_params=pltpu.CompilerParams(
                dimension_semantics=("parallel",),  # no cross-step state -> megacore-friendly
                vmem_limit_bytes=vmem_limit,
            ),
        )(proto_op, psq, queries_padded)

    try:
        return run(True)
    except Exception:
        # pipeline_mode / Buffered(1) not supported by this JAX -> default buffering.
        return run(False)


# -----------------------------------------------------------------------------
# Pure-JAX reference (mirrors the PyTorch module's euclidean forward).
# -----------------------------------------------------------------------------
def _reference_forward(queries, prototypes):
    n = prototypes.shape[0]
    m = queries.shape[0]
    p = jnp.broadcast_to(prototypes[None, :, :], (m, n, prototypes.shape[1]))
    q = jnp.broadcast_to(queries[:, None, :], (m, n, queries.shape[1]))
    return -jnp.sum((p - q) ** 2, axis=2)


class PrototypicalClassifier:
    """distance='euclidean', normalize=False (the module defaults)."""
    # TODO(synk): cosine distance / normalize=True (EPS L2-normalization) path
    # is not kernel-ized; only the default euclidean path is implemented.

    def __init__(self):
        self.prototypes = None
        self._proto_op = None
        self._psq = None
        self._num_classes = None
        self._d = None
        self._d_pad = None
        self._compute_dtype = None

    def fit_(self, support, labels, num_classes=None):
        """Compute and store class-mean prototypes.

        Classes are assumed to be 0..num_classes-1 (the original module uses
        torch.unique; identical whenever every class id in that range appears).
        """
        if num_classes is None:
            num_classes = int(jnp.max(labels)) + 1
        s, d = support.shape
        compute_dtype = support.dtype
        c_pad = _round_up(max(num_classes, 1), 128)   # lane-dense class axis
        d_pad = _round_up(max(d, 1), 128)             # full-width MXU contraction

        # Fold 1/counts into the one-hot (zero rows for padded / missing classes
        # give zero prototypes instead of inf/NaN).
        classes = jnp.arange(num_classes, dtype=labels.dtype)
        onehot = (labels[None, :] == classes[:, None]).astype(jnp.float32)   # (C, S)
        counts = jnp.sum(onehot, axis=1, keepdims=True)
        inv = jnp.where(counts > 0, 1.0 / counts, 0.0)
        onehot_scaled = onehot * inv
        if c_pad != num_classes:
            onehot_scaled = jnp.pad(onehot_scaled, ((0, c_pad - num_classes), (0, 0)))
        support_padded = support if d_pad == d else jnp.pad(
            support, ((0, 0), (0, d_pad - d)))

        protos_pad, proto_op, psq = protonet_fit(
            onehot_scaled, support_padded, compute_dtype)
        self.prototypes = protos_pad[:num_classes, :d].astype(compute_dtype)
        self._proto_op = proto_op
        self._psq = psq
        self._num_classes = num_classes
        self._d = d
        self._d_pad = d_pad
        self._compute_dtype = compute_dtype
        return self.prototypes

    def __call__(self, x):
        assert self._proto_op is not None, "call fit_ first"
        m, d = x.shape
        assert d == self._d
        if x.dtype != self._compute_dtype:
            x = x.astype(self._compute_dtype)
        align = _row_align(self._compute_dtype)
        m_pad = _round_up(m, align)
        pad_rows, pad_cols = m_pad - m, self._d_pad - d
        if pad_rows or pad_cols:
            x = jnp.pad(x, ((0, pad_rows), (0, pad_cols)))
        logits_pad = protonet_forward(self._proto_op, self._psq, x)
        # TODO(synk): for very large M*C the [:m, :C] slice is an extra HBM pass
        # and the kernel could emit bf16 logits; downstream could instead mask
        # the (zero-prototype) padded class columns to -inf and keep the layout.
        return logits_pad[:m, :self._num_classes]


if __name__ == "__main__":
    key = jax.random.PRNGKey(0)
    k_sup, k_qry = jax.random.split(key)

    num_classes = 4   # C
    shots = 2         # per-class support samples
    feat_dim = 32     # D
    num_queries = 8   # M

    support = jax.random.normal(k_sup, (num_classes * shots, feat_dim),
                                dtype=jnp.float32)
    labels = jnp.repeat(jnp.arange(num_classes, dtype=jnp.int32), shots)
    queries = jax.random.normal(k_qry, (num_queries, feat_dim), dtype=jnp.float32)

    # ---- f32 path ----
    clf = PrototypicalClassifier()
    clf.fit_(support, labels, num_classes)
    logits = jax.block_until_ready(clf(queries))
    protos = jax.block_until_ready(clf.prototypes)

    ref_protos = jnp.stack(
        [support[labels == c].mean(axis=0) for c in range(num_classes)], axis=0)
    ref_logits = _reference_forward(queries, ref_protos)

    assert logits.shape == (num_queries, num_classes)
    assert protos.shape == (num_classes, feat_dim)
    assert jnp.allclose(protos, ref_protos, atol=1e-5, rtol=1e-5)
    assert jnp.allclose(logits, ref_logits, atol=5e-4, rtol=5e-4)

    # ---- bf16 path (native-dtype MXU operands; accumulation stays f32) ----
    clf16 = PrototypicalClassifier()
    clf16.fit_(support.astype(jnp.bfloat16), labels, num_classes)
    logits16 = jax.block_until_ready(clf16(queries.astype(jnp.bfloat16)))
    ref_logits16 = _reference_forward(
        queries.astype(jnp.bfloat16).astype(jnp.float32),
        jnp.asarray(clf16.prototypes, jnp.float32))
    assert logits16.shape == (num_queries, num_classes)
    assert jnp.allclose(logits16, ref_logits16, atol=1.0, rtol=5e-2)

    print("KERNEL_OK")
</pallas_src>

<mosaic_0001>
module attributes {stable_mosaic.version = 11 : i64} {
  func.func @_fit_kernel(%arg0: i32, %arg1: memref<128x8xf32, #tpu.memory_space<vmem>>, %arg2: memref<8x128xf32, #tpu.memory_space<vmem>>, %arg3: memref<128x128xf32, #tpu.memory_space<vmem>>, %arg4: memref<128x128xf32, #tpu.memory_space<vmem>>, %arg5: memref<1x128xf32, #tpu.memory_space<vmem>>) attributes {dimension_semantics = [#tpu.dimension_semantics<arbitrary>], iteration_bounds = array<i64: 1>, scalar_prefetch = 0 : i64, scratch_operands = 0 : i64, tpu.core_type = #tpu.core_type<tc>, window_params = [{pipeline_mode = #tpu.pipeline_mode<synchronous>, transform_indices = @transform_0, window_bounds = array<i64: 128, 8>}, {pipeline_mode = #tpu.pipeline_mode<synchronous>, transform_indices = @transform_1, window_bounds = array<i64: 8, 128>}, {pipeline_mode = #tpu.pipeline_mode<synchronous>, transform_indices = @transform_2, window_bounds = array<i64: 128, 128>}, {pipeline_mode = #tpu.pipeline_mode<synchronous>, transform_indices = @transform_3, window_bounds = array<i64: 128, 128>}, {pipeline_mode = #tpu.pipeline_mode<synchronous>, transform_indices = @transform_4, window_bounds = array<i64: 1, 128>}]} {
    %c0 = arith.constant 0 : index
    %c0_0 = arith.constant 0 : index
    %0 = vector.load %arg2[%c0, %c0_0] : memref<8x128xf32, #tpu.memory_space<vmem>>, vector<8x128xf32>
    %c0_1 = arith.constant 0 : index
    %c0_2 = arith.constant 0 : index
    %1 = vector.load %arg1[%c0_1, %c0_2] : memref<128x8xf32, #tpu.memory_space<vmem>>, vector<128x8xf32>
    %cst = arith.constant dense<0.000000e+00> : vector<128x128xf32>
    %2 = tpu.matmul %1, %0, %cst {dimension_numbers = #tpu.dot_dimension_numbers<[1], [0], [0], [1], [0, 0, 1, 1], [], []>} : vector<128x8xf32>, vector<8x128xf32>, vector<128x128xf32> -> vector<128x128xf32>
    %c0_3 = arith.constant 0 : index
    %c0_4 = arith.constant 0 : index
    %3 = vector.load %arg3[%c0_3, %c0_4] : memref<128x128xf32, #tpu.memory_space<vmem>>, vector<128x128xf32>
    tpu.vector_store %arg3[%c0_3, %c0_4], %2 {strides = array<i32>} : memref<128x128xf32, #tpu.memory_space<vmem>>, vector<128x128xf32>,
    %cst_5 = arith.constant 2.000000e+00 : f32
    %4 = vector.broadcast %cst_5 : f32 to vector<128x128xf32>
    %5 = arith.mulf %4, %2 : vector<128x128xf32>
    %c0_6 = arith.constant 0 : index
    %c0_7 = arith.constant 0 : index
    %6 = vector.load %arg4[%c0_6, %c0_7] : memref<128x128xf32, #tpu.memory_space<vmem>>, vector<128x128xf32>
    tpu.vector_store %arg4[%c0_6, %c0_7], %5 {strides = array<i32>} : memref<128x128xf32, #tpu.memory_space<vmem>>, vector<128x128xf32>,
    %7 = arith.mulf %2, %2 : vector<128x128xf32>
    %cst_8 = arith.constant 1.000000e+00 : f32
    %8 = vector.broadcast %cst_8 : f32 to vector<1x128xf32>
    %cst_9 = arith.constant dense<0.000000e+00> : vector<1x128xf32>
    %9 = tpu.matmul %8, %7, %cst_9 {dimension_numbers = #tpu.dot_dimension_numbers<[1], [1], [0], [0], [0, 0, 1, 0], [], []>} : vector<1x128xf32>, vector<128x128xf32>, vector<1x128xf32> -> vector<1x128xf32>
    %c0_10 = arith.constant 0 : index
    %c0_11 = arith.constant 0 : index
    %10 = vector.load %arg5[%c0_10, %c0_11] : memref<1x128xf32, #tpu.memory_space<vmem>>, vector<1x128xf32>
    tpu.vector_store %arg5[%c0_10, %c0_11], %9 {strides = array<i32>} : memref<1x128xf32, #tpu.memory_space<vmem>>, vector<1x128xf32>,
    return
  }
  func.func @transform_0(%arg0: i32) -> (i32, i32) {
    %c0_i32 = arith.constant 0 : i32
    %c0_i32_0 = arith.constant 0 : i32
    %c0_i32_1 = arith.constant 0 : i32
    return %c0_i32, %c0_i32_0 : i32, i32
  }
  func.func @transform_1(%arg0: i32) -> (i32, i32) {
    %c0_i32 = arith.constant 0 : i32
    %c0_i32_0 = arith.constant 0 : i32
    %c0_i32_1 = arith.constant 0 : i32
    return %c0_i32, %c0_i32_0 : i32, i32
  }
  func.func @transform_2(%arg0: i32) -> (i32, i32) {
    %c0_i32 = arith.constant 0 : i32
    %c0_i32_0 = arith.constant 0 : i32
    %c0_i32_1 = arith.constant 0 : i32
    return %c0_i32, %c0_i32_0 : i32, i32
  }
  func.func @transform_3(%arg0: i32) -> (i32, i32) {
    %c0_i32 = arith.constant 0 : i32
    %c0_i32_0 = arith.constant 0 : i32
    %c0_i32_1 = arith.constant 0 : i32
    return %c0_i32, %c0_i32_0 : i32, i32
  }
  func.func @transform_4(%arg0: i32) -> (i32, i32) {
    %c0_i32 = arith.constant 0 : i32
    %c0_i32_0 = arith.constant 0 : i32
    %c0_i32_1 = arith.constant 0 : i32
    return %c0_i32, %c0_i32_0 : i32, i32
  }
}

</mosaic_0001>

<bundles_post_ra>
// kernel: tpu_custom_call.1
= control target key start
LH: loop header
LB: loop body
LE: loop exit
PB: predicated region body
PF: predicated region fallthrough
CT: control target
= control target key end

     0   :  { %10 = vsyncpa [#allocation3], 0  ;;  %vm33_vm0 = vcmask 64512   ;;  %s764_s0 = inlined_call_operand.vmem [shape: f32[128,8], index: 0, kind: input, shape index: {}]   ;;  %s765_s1 = inlined_call_operand.vmem [shape: f32[8,128], index: 1, kind: input, shape index: {}]   ;;  %s766_s2 = inlined_call_operand.hbm [shape: f32[128,128], index: 2, kind: output, shape index: {0}]   ;;  %s767_s3 = inlined_call_operand.hbm [shape: f32[128,128], index: 3, kind: output, shape index: {1}]   ;;  %s768_s4 = inlined_call_operand.hbm [shape: f32[1,128], index: 4, kind: output, shape index: {2}]  }
   0x1   :  { %v16_v0 = vld [vmem:[%s765_s1] sm:$0xff]  ;;  %v18_v2 = vld [vmem:[%s764_s0 + $0x8] sm:$0xff]  ;;  %v19_v3 = vld [vmem:[%s764_s0 + $0x10] sm:$0xff] }
   0x2   :  { %v17_v1 = vld [vmem:[%s764_s0] sm:$0xff]  ;;  %457 = vmatprep.subr.mxu0 %v16_v0  ;;  %v20_v4 = vld [vmem:[%s764_s0 + $0x18] sm:$0xff] }
   0x3   :  { %459 = vmatprep.mubr.msk.f32.mxu0 %vm33_vm0, %v17_v1  ;;  %458 = vmatpush3.msra.mxu0 %v16_v0  ;;  %v21_v5 = vld [vmem:[%s764_s0 + $0x20] sm:$0xff] }
   0x4   :  { %460 = vmatmul.mubr.msk.f32.vlgmr.msra.gmra.mxu0 %vm33_vm0, %v18_v2 }
   0x5   :  { %462 = vmatprep.mubr.msk.f32.mxu0 %vm33_vm0, %v19_v3 }
   0x6   :  { %11 = vsyncpa [#allocation5], 0  ;;  %v22_v6 = vld [vmem:[%s764_s0 + $0x28] sm:$0xff]  ;;  %v23_v7 = vld [vmem:[%s764_s0 + $0x30] sm:$0xff]  ;;  %v590_v17 = vmov 0.0   ;;  %vm591_vm1 = vmmov 0  }
   0x7   :  { %v24_v8 = vld [vmem:[%s764_s0 + $0x38] sm:$0xff]  ;;  %v25_v9 = vld [vmem:[%s764_s0 + $0x40] sm:$0xff]  ;;  %v26_v10 = vld [vmem:[%s764_s0 + $0x48] sm:$0xff]  ;;  %483 = vmatprep.subr.mxu1 %v590_v17  ;;  %515 = vmatprep.mubr.msk.f32.mxu1 %vm591_vm1, %v590_v17  ;;  %v592_v2 = vmov 1.0   ;;  %s594_s1 = smov [#allocation2]  }
   0x8   :  { %463 = vmatmul.mubr.msk.f32.gmra.mxu0 %vm33_vm0, %v20_v4  ;;  %v27_v11 = vld [vmem:[%s764_s0 + $0x50] sm:$0xff]  ;;  %v28_v12 = vld [vmem:[%s764_s0 + $0x58] sm:$0xff]  ;;  %v29_v13 = vld [vmem:[%s764_s0 + $0x60] sm:$0xff]  ;;  %s367_s23 = sshll.u32 %s594_s1, 4  ;;  %s368_s23 = int_to_ptr.vmem [resolvable:$true] %s367_s23 }
   0x9   :  { %465 = vmatprep.mubr.msk.f32.mxu0 %vm33_vm0, %v21_v5  ;;  %v30_v14 = vld [vmem:[%s764_s0 + $0x68] sm:$0xff]  ;;  %v31_v15 = vld [vmem:[%s764_s0 + $0x70] sm:$0xff]  ;;  %v32_v16 = vld [vmem:[%s764_s0 + $0x78] sm:$0xff]  ;;  %s593_s0 = smov [#allocation4]  }
   0xa   :  { %s379_s22 = sshll.u32 %s593_s0, 4  ;;  %s380_s22 = int_to_ptr.vmem [resolvable:$true] %s379_s22 }
   0xb   :  { %s526_s24 = scalar_lea.vmem %s380_s22, 2048  ;;  %p531_p1 = scmp.lt.s32.totalorder %s380_s22, %s380_s22 }
   0xc   :  { %466 = vmatmul.mubr.msk.f32.gmra.mxu0 %vm33_vm0, %v22_v6  ;;  %p527_p0 = scmp.ne.s32.totalorder %s380_s22, %s526_s24  ;;  %p532_p2 = scmp.lt.s32.totalorder %s526_s24, %s526_s24 }
   0xd   :  { %468 = vmatprep.mubr.msk.f32.mxu0 %vm33_vm0, %v23_v7 }
   0xe   :  { %p533_p3 = por %p532_p2, %p531_p1 }
  0x10   :  { %469 = vmatmul.mubr.msk.f32.gmra.mxu0 %vm33_vm0, %v24_v8  ;;  %p534_p4 = pnand %p533_p3, %p527_p0 }
  0x11   :  { %471 = vmatprep.mubr.msk.f32.mxu0 %vm33_vm0, %v25_v9 }
  0x14   :  { %472 = vmatmul.mubr.msk.f32.gmra.mxu0 %vm33_vm0, %v26_v10 }
  0x15   :  { %474 = vmatprep.mubr.msk.f32.mxu0 %vm33_vm0, %v27_v11 }
  0x18   :  { %475 = vmatmul.mubr.msk.f32.gmra.mxu0 %vm33_vm0, %v28_v12 }
  0x19   :  { %477 = vmatprep.mubr.msk.f32.mxu0 %vm33_vm0, %v29_v13 }
  0x1c   :  { %478 = vmatmul.mubr.msk.f32.gmra.mxu0 %vm33_vm0, %v30_v14 }
  0x1d   :  { %480 = vmatprep.mubr.msk.f32.mxu0 %vm33_vm0, %v31_v15 }
  0x20   :  { %481 = vmatmul.mubr.msk.f32.gmra.mxu0 %vm33_vm0, %v32_v16 }
  0xc4   :  { %v692_v18 = vpop.f32.mrf.mxu0 }
  0xc5   :  { %228 = vst [vmem:[#allocation2 + $0x8] sm:$0xff] %v692_v18  ;;  %v244_v19 = vmul.f32 2.0, %v692_v18  ;;  %v276_v0 = vmul.f32 %v692_v18, %v692_v18 }
  0xc6   :  { %v696_v20 = vpop.f32.mrf.mxu0 }
  0xc7   :  { %260 = vst [vmem:[#allocation4 + $0x8] sm:$0xff] %v244_v19  ;;  %227 = vst [vmem:[#allocation2] sm:$0xff] %v696_v20  ;;  %v243_v21 = vmul.f32 2.0, %v696_v20  ;;  %v275_v1 = vmul.f32 %v696_v20, %v696_v20 }
  0xc8   :  { %v700_v22 = vpop.f32.mrf.mxu0 }
  0xc9   :  { %259 = vst [vmem:[#allocation4] sm:$0xff] %v243_v21  ;;  %230 = vst [vmem:[#allocation2 + $0x18] sm:$0xff] %v700_v22  ;;  %v246_v23 = vmul.f32 2.0, %v700_v22  ;;  %v278_v62 = vmul.f32 %v700_v22, %v700_v22 }
  0xca   :  { %v704_v24 = vpop.f32.mrf.mxu0 }
  0xcb   :  { %262 = vst [vmem:[#allocation4 + $0x18] sm:$0xff] %v246_v23  ;;  %229 = vst [vmem:[#allocation2 + $0x10] sm:$0xff] %v704_v24  ;;  %v245_v25 = vmul.f32 2.0, %v704_v24  ;;  %v277_v63 = vmul.f32 %v704_v24, %v704_v24 }
  0xcc   :  { %v708_v26 = vpop.f32.mrf.mxu0 }
  0xcd   :  { %261 = vst [vmem:[#allocation4 + $0x10] sm:$0xff] %v245_v25  ;;  %232 = vst [vmem:[#allocation2 + $0x28] sm:$0xff] %v708_v26  ;;  %v248_v27 = vmul.f32 2.0, %v708_v26  ;;  %v280_v60 = vmul.f32 %v708_v26, %v708_v26 }
  0xce   :  { %v712_v28 = vpop.f32.mrf.mxu0 }
  0xcf   :  { %264 = vst [vmem:[#allocation4 + $0x28] sm:$0xff] %v248_v27  ;;  %231 = vst [vmem:[#allocation2 + $0x20] sm:$0xff] %v712_v28  ;;  %v247_v29 = vmul.f32 2.0, %v712_v28  ;;  %v279_v61 = vmul.f32 %v712_v28, %v712_v28 }
  0xd0   :  { %v716_v30 = vpop.f32.mrf.mxu0 }
  0xd1   :  { %263 = vst [vmem:[#allocation4 + $0x20] sm:$0xff] %v247_v29  ;;  %234 = vst [vmem:[#allocation2 + $0x38] sm:$0xff] %v716_v30  ;;  %v250_v31 = vmul.f32 2.0, %v716_v30  ;;  %v282_v58 = vmul.f32 %v716_v30, %v716_v30 }
  0xd2   :  { %v720_v32 = vpop.f32.mrf.mxu0 }
  0xd3   :  { %266 = vst [vmem:[#allocation4 + $0x38] sm:$0xff] %v250_v31  ;;  %233 = vst [vmem:[#allocation2 + $0x30] sm:$0xff] %v720_v32  ;;  %v249_v33 = vmul.f32 2.0, %v720_v32  ;;  %v281_v59 = vmul.f32 %v720_v32, %v720_v32 }
  0xd4   :  { %v473_v34 = vpop.f32.mrf.mxu0 }
  0xd5   :  { %265 = vst [vmem:[#allocation4 + $0x30] sm:$0xff] %v249_v33  ;;  %236 = vst [vmem:[#allocation2 + $0x48] sm:$0xff] %v473_v34  ;;  %v252_v35 = vmul.f32 2.0, %v473_v34  ;;  %v284_v56 = vmul.f32 %v473_v34, %v473_v34 }
  0xd6   :  { %v188_v36 = vpop.f32.mrf.mxu0 }
  0xd7   :  { %268 = vst [vmem:[#allocation4 + $0x48] sm:$0xff] %v252_v35  ;;  %235 = vst [vmem:[#allocation2 + $0x40] sm:$0xff] %v188_v36  ;;  %v251_v37 = vmul.f32 2.0, %v188_v36  ;;  %v283_v57 = vmul.f32 %v188_v36, %v188_v36 }
  0xd8   :  { %v476_v38 = vpop.f32.mrf.mxu0 }
  0xd9   :  { %267 = vst [vmem:[#allocation4 + $0x40] sm:$0xff] %v251_v37  ;;  %238 = vst [vmem:[#allocation2 + $0x58] sm:$0xff] %v476_v38  ;;  %v254_v39 = vmul.f32 2.0, %v476_v38  ;;  %v286_v54 = vmul.f32 %v476_v38, %v476_v38 }
  0xda   :  { %v198_v40 = vpop.f32.mrf.mxu0 }
  0xdb   :  { %270 = vst [vmem:[#allocation4 + $0x58] sm:$0xff] %v254_v39  ;;  %237 = vst [vmem:[#allocation2 + $0x50] sm:$0xff] %v198_v40  ;;  %v253_v41 = vmul.f32 2.0, %v198_v40  ;;  %v285_v55 = vmul.f32 %v198_v40, %v198_v40 }
  0xdc   :  { %v479_v42 = vpop.f32.mrf.mxu0 }
  0xdd   :  { %269 = vst [vmem:[#allocation4 + $0x50] sm:$0xff] %v253_v41  ;;  %240 = vst [vmem:[#allocation2 + $0x68] sm:$0xff] %v479_v42  ;;  %v256_v43 = vmul.f32 2.0, %v479_v42  ;;  %v288_v52 = vmul.f32 %v479_v42, %v479_v42 }
  0xde   :  { %v208_v44 = vpop.f32.mrf.mxu0 }
  0xdf   :  { %272 = vst [vmem:[#allocation4 + $0x68] sm:$0xff] %v256_v43  ;;  %239 = vst [vmem:[#allocation2 + $0x60] sm:$0xff] %v208_v44  ;;  %v255_v45 = vmul.f32 2.0, %v208_v44  ;;  %v287_v53 = vmul.f32 %v208_v44, %v208_v44 }
  0xe0   :  { %v482_v46 = vpop.f32.mrf.mxu0 }
  0xe1   :  { %271 = vst [vmem:[#allocation4 + $0x60] sm:$0xff] %v255_v45  ;;  %242 = vst [vmem:[#allocation2 + $0x78] sm:$0xff] %v482_v46  ;;  %v258_v47 = vmul.f32 2.0, %v482_v46  ;;  %v290_v48 = vmul.f32 %v482_v46, %v482_v46 }
  0xe2   :  { %v218_v49 = vpop.f32.mrf.mxu0 }
  0xe3   :  { %274 = vst [vmem:[#allocation4 + $0x78] sm:$0xff] %v258_v47  ;;  %241 = vst [vmem:[#allocation2 + $0x70] sm:$0xff] %v218_v49  ;;  %v257_v50 = vmul.f32 2.0, %v218_v49  ;;  %484 = vmatpush3.xpose.msra.mxu1 %v290_v48  ;;  %v289_v51 = vmul.f32 %v218_v49, %v218_v49 }
  0xe4   :  { %485 = vmatprep.subr.mxu1 %v590_v17 }
  0xe5   :  { %273 = vst [vmem:[#allocation4 + $0x70] sm:$0xff] %v257_v50 }
  0xe7   :  { %486 = vmatpush3.xpose.msra.mxu1 %v289_v51 }
  0xe8   :  { %487 = vmatprep.subr.mxu1 %v590_v17 }
  0xeb   :  { %488 = vmatpush3.xpose.msra.mxu1 %v288_v52 }
  0xec   :  { %489 = vmatprep.subr.mxu1 %v590_v17 }
  0xef   :  { %490 = vmatpush3.xpose.msra.mxu1 %v287_v53 }
  0xf0   :  { %491 = vmatprep.subr.mxu1 %v590_v17 }
  0xf3   :  { %492 = vmatpush3.xpose.msra.mxu1 %v286_v54 }
  0xf4   :  { %493 = vmatprep.subr.mxu1 %v590_v17 }
  0xf7   :  { %494 = vmatpush3.xpose.msra.mxu1 %v285_v55 }
  0xf8   :  { %495 = vmatprep.subr.mxu1 %v590_v17 }
  0xfb   :  { %496 = vmatpush3.xpose.msra.mxu1 %v284_v56 }
  0xfc   :  { %497 = vmatprep.subr.mxu1 %v590_v17 }
  0xff   :  { %498 = vmatpush3.xpose.msra.mxu1 %v283_v57 }
 0x100   :  { %499 = vmatprep.subr.mxu1 %v590_v17 }
 0x103   :  { %500 = vmatpush3.xpose.msra.mxu1 %v282_v58 }
 0x104   :  { %501 = vmatprep.subr.mxu1 %v590_v17 }
 0x107   :  { %502 = vmatpush3.xpose.msra.mxu1 %v281_v59 }
 0x108   :  { %503 = vmatprep.subr.mxu1 %v590_v17 }
 0x10b   :  { %504 = vmatpush3.xpose.msra.mxu1 %v280_v60 }
 0x10c   :  { %505 = vmatprep.subr.mxu1 %v590_v17 }
 0x10f   :  { %506 = vmatpush3.xpose.msra.mxu1 %v279_v61 }
 0x110   :  { %507 = vmatprep.subr.mxu1 %v590_v17 }
 0x113   :  { %508 = vmatpush3.xpose.msra.mxu1 %v278_v62 }
 0x114   :  { %509 = vmatprep.subr.mxu1 %v590_v17 }
 0x117   :  { %510 = vmatpush3.xpose.msra.mxu1 %v277_v63 }
 0x118   :  { %511 = vmatprep.subr.mxu1 %v590_v17 }
 0x11b   :  { %512 = vmatpush3.xpose.msra.mxu1 %v276_v0 }
 0x11c   :  { %513 = vmatprep.subr.mxu1 %v590_v17 }
 0x11f   :  { %514 = vmatpush3.xpose.msra.mxu1 %v275_v1 }
 0x122   :  { %516 = vmatmul.mubr.f32.vlgmr.msra.gmra.mxu1 %v592_v2 }
 0x123   :  { %537 = shalt.err (!%p534_p4)
}
 0x124   :  { %s595_s25 = smov 128   ;;  %s596_s26 = smov 8  }
 0x125   :  { %385 = dma.vmem_to_hbm [thread:$0]  %s380_s22, 2048, %s767_s3, [#allocation5], %s595_s25, %s595_s25, %s596_s26  }
 0x126   :  { %s546_s29 = scalar_lea.vmem %s368_s23, 2048  ;;  %p551_p6 = scmp.lt.s32.totalorder %s368_s23, %s368_s23 }
 0x127   :  { %p547_p5 = scmp.ne.s32.totalorder %s368_s23, %s546_s29  ;;  %p552_p7 = scmp.lt.s32.totalorder %s546_s29, %s546_s29 }
 0x129   :  { %p553_p8 = por %p552_p7, %p551_p6 }
 0x12b   :  { %p554_p9 = pnand %p553_p8, %p547_p5 }
 0x12d   :  { %557 = shalt.err (!%p554_p9)
}
 0x12e   :  { %373 = dma.vmem_to_hbm [thread:$0]  %s368_s23, 2048, %s766_s2, [#allocation3], %s595_s25, %s595_s25, %s596_s26  }
 0x12f   :  { %s597_s6 = smov [#allocation6]  }
 0x130   :  { %s392_s7 = sshll.u32 %s597_s6, 4  ;;  %s393_s7 = int_to_ptr.vmem [resolvable:$true] %s392_s7 }
 0x131   :  { %s566_s8 = scalar_lea.vmem %s393_s7, 16  ;;  %s570_s3 = scalar_lea.vmem %s393_s7, 32 }
 0x132   :  { %p567_p10 = scmp.ne.s32.totalorder %s393_s7, %s566_s8  ;;  %p571_p11 = scmp.lt.s32.totalorder %s393_s7, %s393_s7 }
 0x133   :  { %p572_p12 = scmp.lt.s32.totalorder %s570_s3, %s566_s8 }
 0x135   :  { %p573_p13 = por %p572_p12, %p571_p11 }
 0x137   :  { %p574_p0 = pnand %p573_p13, %p567_p10 }
 0x1e2   :  { %v357_v3 = vpop.f32.mrf.mxu1 }
 0x1e3   :  { %361 = vst [vmem:[#allocation6] sm:$0x1] %v357_v3 }
 0x1e4   :  { %v517_v4 = vpop.f32.mrf.mxu1 }
 0x1e5   :  { %577 = shalt.err (!%p574_p0)
}
 0x1e6   :  { %395 = dma.vmem_to_hbm [thread:$0]  %s393_s7, 16, %s768_s4, [#allocation5]  }
 0x1e7   :  { %586 = dma.done.wait [#allocation3], 2048  }
 0x1e8   :  { %587 = vsyncadd [#allocation3], 4294965248 }
 0x1e9   :  { %588 = dma.done.wait [#allocation5], 2064  }
 0x1ea   :  { %589 = vsyncadd [#allocation5], 4294965232 }
 0x1eb   :  { %405 = vsyncpa [#allocation3], 1 }
 0x1ec   :  { %406 = vsyncpa [#allocation5], 1 }

</bundles_post_ra>
